<compile_context>
chip_gen: v7x
topology: tpu7x:2x2x1
jax: 0.10.0
libtpu: 0.0.40
codegen_flags: <defaults>
</compile_context>

<pallas_src>
import functools

import numpy as np

import jax
import jax.numpy as jnp
from jax.experimental import pallas as pl
from jax.experimental.pallas import tpu as pltpu

_LANES = 128
_SIG_ROW_BLOCK = 4096              # (4096, 128) f32 = 2 MiB logits per block
_SM_LOGIT_BLOCK_BYTES = 2 << 20    # aim ~2 MiB of logits per softmax block
_SM_INPUT_VMEM_BUDGET = 12 << 20   # double-buffered softmax inputs (v5e-portable)
_VMEM_LIMIT = 32 << 20             # explicit scoped-VMEM limit (< v7x 64 MiB physical)
_EPS = 1e-8


def _round_up(v, m):
    return ((v + m - 1) // m) * m


def _is_unit_weight(class_weight):
    """Static check so the kernel can skip the weight gather/multiply."""
    if class_weight is None:
        return True
    try:
        return bool(np.all(np.asarray(class_weight, dtype=np.float64) == 1.0))
    except Exception:          # traced / abstract weights -> keep the multiply
        return False


def _focal_pow(base, gamma):
    """(1 - pt)**gamma; integer gamma becomes plain VPU multiplies (no EUP)."""
    g = float(gamma)
    if g.is_integer() and 0 <= g <= 8:
        gi = int(g)
        if gi == 0:
            return jnp.ones_like(base)
        out = base
        for _ in range(gi - 1):
            out = out * base
        return out
    return base ** gamma        # non-integer gamma -> exp/log path


# ----------------------------- kernels ------------------------------------- #

def _focal_sigmoid_kernel(w_ref, logit_ref, target_ref, out_ref, *,
                          gamma, total_rows, block_rows, needs_row_mask,
                          unit_weight):
    x = logit_ref[...].astype(jnp.float32)             # (rb, 128)
    t = target_ref[...]                                 # (rb, 128) native dtype
    pos = t != 0                                         # target == 1 selection
    p = jax.nn.sigmoid(x)
    # prob = cat(1-p, p); one-hot select == p if t==1 else 1-p
    pt = jnp.where(pos, p, 1.0 - p)
    pt = jnp.clip(pt, _EPS, 1.0 - _EPS)
    loss = _focal_pow(1.0 - pt, gamma) * (-jnp.log(pt))
    if not unit_weight:                                  # skip when weights are all 1
        loss = loss * jnp.where(pos, w_ref[1], w_ref[0])

    if needs_row_mask:
        # Only the LAST grid step carries a Pallas-padded partial row block;
        # keep the mask (row-index based -> independent of undefined padded
        # data) off the hot path of every other step.
        i = pl.program_id(0)
        last = pl.num_programs(0) - 1

        @pl.when(i != last)
        def _():
            out_ref[0] = jnp.sum(loss, axis=0, keepdims=True)

        @pl.when(i == last)
        def _():
            row = jax.lax.broadcasted_iota(jnp.int32, loss.shape, 0)
            valid = (i * block_rows + row) < total_rows
            out_ref[0] = jnp.sum(jnp.where(valid, loss, 0.0), axis=0,
                                 keepdims=True)
    else:
        out_ref[0] = jnp.sum(loss, axis=0, keepdims=True)   # (1, 128) partial


def _focal_softmax_kernel(logit_ref, target_ref, w_ref, out_ref, *,
                          gamma, hw, pix_tile, needs_mask, unit_weight):
    x = logit_ref[0].astype(jnp.float32)                # (C, PT), classes on sublanes
    t = target_ref[0]                                    # (1, PT) native int dtype

    m = jnp.max(x, axis=0, keepdims=True)                # (1, PT)
    e = jnp.exp(x - m)
    denom = jnp.sum(e, axis=0, keepdims=True)
    cls = jax.lax.broadcasted_iota(jnp.int32, x.shape, 0)
    sel = (cls == t).astype(jnp.float32)                 # one-hot scatter_(1, target, 1)
    num = jnp.sum(e * sel, axis=0, keepdims=True)
    # Exact divide on purpose: pl.reciprocal(approx=True) costs ~2e-4 relative
    # error on pt, which is visible against the 1e-5 reference tolerance.
    pt = num / denom
    pt = jnp.clip(pt, _EPS, 1.0 - _EPS)
    loss = _focal_pow(1.0 - pt, gamma) * (-jnp.log(pt))
    if not unit_weight:
        w = w_ref[...].astype(jnp.float32)               # (C, 1)
        cw = jnp.sum(sel * w, axis=0, keepdims=True)     # vectorized gather(weight, t)
        loss = loss * cw

    if needs_mask:
        # Only the last pixel tile is partial (Pallas-padded) -> mask only there.
        j = pl.program_id(1)
        last = pl.num_programs(1) - 1

        @pl.when(j != last)
        def _():
            out_ref[0] = loss

        @pl.when(j == last)
        def _():
            pix = j * pix_tile + jax.lax.broadcasted_iota(jnp.int32,
                                                          loss.shape, 1)
            out_ref[0] = jnp.where(pix < hw, loss, 0.0)
    else:
        out_ref[0] = loss                                # (1, PT) per-lane partial


# ----------------------------- helpers -------------------------------------- #

def _sigmoid_tail_sum(x_tail, t_tail, cw, gamma, unit_weight):
    """Plain-JAX loss sum for the <128-element ragged tail (n % 128 != 0)."""
    x = x_tail.astype(jnp.float32)
    pos = t_tail != 0
    p = jax.nn.sigmoid(x)
    pt = jnp.clip(jnp.where(pos, p, 1.0 - p), _EPS, 1.0 - _EPS)
    loss = ((1.0 - pt) ** gamma) * (-jnp.log(pt))
    if not unit_weight:
        loss = loss * jnp.where(pos, cw[1], cw[0])
    return jnp.sum(loss)


# ----------------------------- wrapper -------------------------------------- #

def focal_loss_2d(logit, target, class_weight=None, type='sigmoid',
                  gamma=2, size_average=True, pix_block=None, sig_row_block=None):
    if not size_average:
        # TODO(synk): size_average=False (per-element batch_loss output) not wired up.
        raise NotImplementedError("size_average=False not implemented")

    if type == 'sigmoid':
        unit_weight = _is_unit_weight(class_weight)
        if class_weight is None:
            class_weight = [1.0, 1.0]
        cw = jnp.asarray(class_weight, jnp.float32).reshape(-1)

        x = logit.reshape(-1)                    # free view; native dtype
        t = target.reshape(-1)                   # free view; native (narrow) dtype
        n = x.shape[0]
        rows = n // _LANES
        rem = n - rows * _LANES

        tail_sum = jnp.zeros((), jnp.float32)
        if rem:
            # Ragged tail (< 128 elems) in plain JAX: no jnp.pad of the whole
            # tensor and no per-element lane mask inside the kernel.  (In this
            # rare misaligned case XLA materializes the aligned prefix slice,
            # which costs no more than the old pad did.)
            tail_sum = _sigmoid_tail_sum(x[rows * _LANES:], t[rows * _LANES:],
                                         cw, gamma, unit_weight)
            if rows == 0:
                return tail_sum / n
            x = x[:rows * _LANES]
            t = t[:rows * _LANES]

        x2 = x.reshape(rows, _LANES)
        t2 = t.reshape(rows, _LANES)

        max_rb = sig_row_block if sig_row_block is not None else _SIG_ROW_BLOCK
        if rows <= 64:
            rb = rows            # tiny input: one full-extent block
        else:
            # keep the grid >= 2 so both v7x TensorCores get work; keep the row
            # block a multiple of 32 so int8/bool targets stay tile-aligned.
            rb = min(max_rb, _round_up(pl.cdiv(rows, 2), 32))
        grid = pl.cdiv(rows, rb)
        needs_row_mask = (grid * rb) != rows

        kernel = functools.partial(_focal_sigmoid_kernel, gamma=gamma,
                                   total_rows=rows, block_rows=rb,
                                   needs_row_mask=needs_row_mask,
                                   unit_weight=unit_weight)
        partials = pl.pallas_call(
            kernel,
            out_shape=jax.ShapeDtypeStruct((grid, 1, _LANES), jnp.float32),
            grid_spec=pltpu.PrefetchScalarGridSpec(
                num_scalar_prefetch=1,
                grid=(grid,),
                in_specs=[pl.BlockSpec((rb, _LANES), lambda i, w: (i, 0)),
                          pl.BlockSpec((rb, _LANES), lambda i, w: (i, 0))],
                out_specs=pl.BlockSpec((1, 1, _LANES), lambda i, w: (i, 0, 0))),
            compiler_params=pltpu.CompilerParams(
                dimension_semantics=("parallel",),
                vmem_limit_bytes=_VMEM_LIMIT),
        )(cw, x2, t2)
        return (jnp.sum(partials) + tail_sum) / n

    elif type == 'softmax':
        B, C, H, W = logit.shape
        HW = H * W
        unit_weight = _is_unit_weight(class_weight)
        if class_weight is None:
            class_weight = [1.0] * C
        cw = jnp.asarray(class_weight, jnp.float32).reshape(C, 1)

        x = logit.reshape(B, C, HW)       # free view: NO NHWC transpose
        t = target.reshape(B, 1, HW)      # native dtype: NO astype HBM pass

        if pix_block is not None:
            pix_tile = _round_up(int(pix_block), _LANES)
        else:
            # adaptive pixel tile: ~2 MiB of f32 logits per block, capped so the
            # double-buffered inputs stay within a v5e-portable VMEM budget.
            tgt_bytes = t.dtype.itemsize
            pix_tile = max((_SM_LOGIT_BLOCK_BYTES // (4 * C)) // _LANES * _LANES,
                           _LANES)
            cap = max((_SM_INPUT_VMEM_BUDGET // (2 * (4 * C + tgt_bytes)))
                      // _LANES * _LANES, _LANES)
            pix_tile = min(pix_tile, cap)
        pix_tile = min(pix_tile, _round_up(HW, _LANES))   # never bigger than needed

        nj = pl.cdiv(HW, pix_tile)
        needs_mask = (nj * pix_tile) != HW

        kernel = functools.partial(_focal_softmax_kernel, gamma=gamma, hw=HW,
                                   pix_tile=pix_tile, needs_mask=needs_mask,
                                   unit_weight=unit_weight)
        partials = pl.pallas_call(
            kernel,
            out_shape=jax.ShapeDtypeStruct((B * nj, 1, pix_tile), jnp.float32),
            grid_spec=pltpu.PrefetchScalarGridSpec(
                num_scalar_prefetch=0,
                grid=(B, nj),
                in_specs=[pl.BlockSpec((1, C, pix_tile), lambda b, j: (b, 0, j)),
                          pl.BlockSpec((1, 1, pix_tile), lambda b, j: (b, 0, j)),
                          pl.BlockSpec((C, 1), lambda b, j: (0, 0))],
                out_specs=pl.BlockSpec((1, 1, pix_tile),
                                       lambda b, j: (b * nj + j, 0, 0))),
            compiler_params=pltpu.CompilerParams(
                dimension_semantics=("parallel", "parallel"),
                vmem_limit_bytes=_VMEM_LIMIT),
        )(x, t, cw)
        return jnp.sum(partials) / (B * HW)

    else:
        raise ValueError(f"unknown type: {type}")


# ----------------------------- references ----------------------------------- #

def _ref_focal_sigmoid(logit, target, gamma, class_weight=(1.0, 1.0)):
    p = jax.nn.sigmoid(logit.reshape(-1).astype(jnp.float32))
    t = target.reshape(-1)
    pt = jnp.where(t == 1, p, 1.0 - p)
    pt = jnp.clip(pt, _EPS, 1.0 - _EPS)
    cw = jnp.where(t == 1, class_weight[1], class_weight[0]).astype(jnp.float32)
    return jnp.mean(-cw * ((1.0 - pt) ** gamma) * jnp.log(pt))


def _ref_focal_softmax(logit, target, gamma, class_weight=None):
    B, C, H, W = logit.shape
    x = jnp.transpose(logit, (0, 2, 3, 1)).reshape(-1, C).astype(jnp.float32)
    t = target.reshape(-1)
    prob = jax.nn.softmax(x, axis=1)
    pt = jnp.take_along_axis(prob, t[:, None].astype(jnp.int32), axis=1)[:, 0]
    pt = jnp.clip(pt, _EPS, 1.0 - _EPS)
    cw = 1.0 if class_weight is None else jnp.asarray(class_weight, jnp.float32)[t]
    return jnp.mean(-cw * ((1.0 - pt) ** gamma) * jnp.log(pt))


# ----------------------------- main ------------------------------------------ #

if __name__ == "__main__":
    key = jax.random.PRNGKey(0)
    keys = jax.random.split(key, 12)

    # --- small shapes (module-typical) ---
    logit_sig = jax.random.normal(keys[0], (2, 1, 16, 16), jnp.float32)
    target_sig = jax.random.bernoulli(keys[1], 0.5, (2, 1, 16, 16)).astype(jnp.int8)
    loss_sig = focal_loss_2d(logit_sig, target_sig, type='sigmoid')
    jax.block_until_ready(loss_sig)
    ref_sig = _ref_focal_sigmoid(logit_sig, target_sig, 2)
    assert jnp.allclose(loss_sig, ref_sig, atol=1e-5, rtol=1e-5), (loss_sig, ref_sig)

    logit_sm = jax.random.normal(keys[2], (2, 4, 16, 16), jnp.float32)
    target_sm = jax.random.randint(keys[3], (2, 16, 16), 0, 4, jnp.int32)
    loss_sm = focal_loss_2d(logit_sm, target_sm, type='softmax')
    jax.block_until_ready(loss_sm)
    ref_sm = _ref_focal_softmax(logit_sm, target_sm, 2)
    assert jnp.allclose(loss_sm, ref_sm, atol=1e-5, rtol=1e-5), (loss_sm, ref_sm)

    # --- medium shapes: multi-step sigmoid grid (grid == 2) + bigger softmax ---
    logit_sig2 = jax.random.normal(keys[4], (2, 1, 256, 512), jnp.float32)
    target_sig2 = jax.random.bernoulli(keys[5], 0.5, (2, 1, 256, 512)).astype(jnp.int8)
    loss_sig2 = focal_loss_2d(logit_sig2, target_sig2, type='sigmoid')
    jax.block_until_ready(loss_sig2)
    ref_sig2 = _ref_focal_sigmoid(logit_sig2, target_sig2, 2)
    assert jnp.allclose(loss_sig2, ref_sig2, atol=1e-4, rtol=1e-4), (loss_sig2, ref_sig2)

    logit_sm2 = jax.random.normal(keys[6], (2, 4, 128, 128), jnp.float32)
    target_sm2 = jax.random.randint(keys[7], (2, 128, 128), 0, 4, jnp.int32)
    loss_sm2 = focal_loss_2d(logit_sm2, target_sm2, type='softmax')
    jax.block_until_ready(loss_sm2)
    ref_sm2 = _ref_focal_softmax(logit_sm2, target_sm2, 2)
    assert jnp.allclose(loss_sm2, ref_sm2, atol=1e-4, rtol=1e-4), (loss_sm2, ref_sm2)

    # --- misaligned sigmoid: ragged tail (n % 128 != 0) + partial row block
    #     mask + non-unit class weights ---
    logit_sig3 = jax.random.normal(keys[8], (1, 1, 150, 129), jnp.float32)
    target_sig3 = jax.random.bernoulli(keys[9], 0.5, (1, 1, 150, 129)).astype(jnp.int8)
    loss_sig3 = focal_loss_2d(logit_sig3, target_sig3, type='sigmoid',
                              class_weight=[0.25, 0.75])
    jax.block_until_ready(loss_sig3)
    ref_sig3 = _ref_focal_sigmoid(logit_sig3, target_sig3, 2,
                                  class_weight=(0.25, 0.75))
    assert jnp.allclose(loss_sig3, ref_sig3, atol=1e-5, rtol=1e-4), (loss_sig3, ref_sig3)

    # --- misaligned softmax: HW % pix_tile != 0 with nj > 1, both-parallel grid
    #     and non-unit class weights ---
    logit_sm3 = jax.random.normal(keys[10], (2, 4, 60, 60), jnp.float32)
    target_sm3 = jax.random.randint(keys[11], (2, 60, 60), 0, 4, jnp.int32)
    loss_sm3 = focal_loss_2d(logit_sm3, target_sm3, type='softmax',
                             class_weight=[0.5, 1.0, 1.5, 2.0], pix_block=512)
    jax.block_until_ready(loss_sm3)
    ref_sm3 = _ref_focal_softmax(logit_sm3, target_sm3, 2,
                                 class_weight=(0.5, 1.0, 1.5, 2.0))
    assert jnp.allclose(loss_sm3, ref_sm3, atol=1e-5, rtol=1e-4), (loss_sm3, ref_sm3)

    print("KERNEL_OK")
</pallas_src>

<mosaic_0001>
module attributes {stable_mosaic.version = 11 : i64} {
  func.func @_focal_sigmoid_kernel(%arg0: i32, %arg1: memref<2xf32, #tpu.memory_space<smem>>, %arg2: memref<4x128xf32, #tpu.memory_space<vmem>>, %arg3: memref<4x128xi8, #tpu.memory_space<vmem>>, %arg4: memref<1x1x128xf32, #tpu.memory_space<vmem>>) attributes {dimension_semantics = [#tpu.dimension_semantics<parallel>], iteration_bounds = array<i64: 1>, scalar_prefetch = 1 : i64, scratch_operands = 0 : i64, tpu.core_type = #tpu.core_type<tc>, window_params = [{transform_indices = @transform_0, window_bounds = array<i64: 4, 128>}, {transform_indices = @transform_1, window_bounds = array<i64: 4, 128>}, {transform_indices = @transform_2, window_bounds = array<i64: 1, 1, 128>}]} {
    %c0 = arith.constant 0 : index
    %c0_0 = arith.constant 0 : index
    %0 = vector.load %arg2[%c0, %c0_0] : memref<4x128xf32, #tpu.memory_space<vmem>>, vector<4x128xf32>
    %c0_1 = arith.constant 0 : index
    %c0_2 = arith.constant 0 : index
    %1 = vector.load %arg3[%c0_1, %c0_2] : memref<4x128xi8, #tpu.memory_space<vmem>>, vector<4x128xi8>
    %c0_i8 = arith.constant 0 : i8
    %2 = vector.broadcast %c0_i8 : i8 to vector<4x128xi8>
    %3 = arith.cmpi ne, %1, %2 : vector<4x128xi8>
    %4 = arith.negf %0 : vector<4x128xf32>
    %5 = math.exp %4 : vector<4x128xf32>
    %cst = arith.constant 1.000000e+00 : f32
    %6 = vector.broadcast %cst : f32 to vector<4x128xf32>
    %7 = arith.addf %6, %5 : vector<4x128xf32>
    %8 = arith.divf %6, %7 : vector<4x128xf32>
    %cst_3 = arith.constant 1.000000e+00 : f32
    %9 = vector.broadcast %cst_3 : f32 to vector<4x128xf32>
    %10 = arith.subf %9, %8 : vector<4x128xf32>
    %11 = arith.select %3, %8, %10 : vector<4x128xi1>, vector<4x128xf32>
    %cst_4 = arith.constant 9.99999993E-9 : f32
    %cst_5 = arith.constant 1.000000e+00 : f32
    %12 = vector.broadcast %cst_4 : f32 to vector<4x128xf32>
    %13 = arith.maximumf %12, %11 : vector<4x128xf32>
    %14 = vector.broadcast %cst_5 : f32 to vector<4x128xf32>
    %15 = arith.minimumf %14, %13 : vector<4x128xf32>
    %cst_6 = arith.constant 1.000000e+00 : f32
    %16 = vector.broadcast %cst_6 : f32 to vector<4x128xf32>
    %17 = arith.subf %16, %15 : vector<4x128xf32>
    %18 = arith.mulf %17, %17 : vector<4x128xf32>
    %19 = math.log %15 : vector<4x128xf32>
    %cst_7 = arith.constant 0.000000e+00 : f32
    %20 = vector.broadcast %cst_7 : f32 to vector<4x128xf32>
    %21 = arith.subf %20, %19 : vector<4x128xf32>
    %22 = arith.mulf %18, %21 : vector<4x128xf32>
    %cst_8 = arith.constant dense<0.000000e+00> : vector<128xf32>
    %23 = vector.multi_reduction <add>, %22, %cst_8 [0] : vector<4x128xf32> to vector<128xf32>
    %24 = vector.shape_cast %23 : vector<128xf32> to vector<1x128xf32>
    %c0_9 = arith.constant 0 : index
    %c0_10 = arith.constant 0 : index
    %c0_11 = arith.constant 0 : index
    %25 = vector.load %arg4[%c0_9, %c0_10, %c0_11] : memref<1x1x128xf32, #tpu.memory_space<vmem>>, vector<1x1x128xf32>
    %26 = vector.shape_cast %25 : vector<1x1x128xf32> to vector<1x128xf32>
    %27 = vector.shape_cast %24 : vector<1x128xf32> to vector<1x1x128xf32>
    tpu.vector_store %arg4[%c0_9, %c0_10, %c0_11], %27 {strides = array<i32>} : memref<1x1x128xf32, #tpu.memory_space<vmem>>, vector<1x1x128xf32>,
    return
  }
  func.func @transform_0(%arg0: i32, %arg1: memref<2xf32, #tpu.memory_space<smem>>) -> (i32, i32) {
    %c0_i32 = arith.constant 0 : i32
    %c0_i32_0 = arith.constant 0 : i32
    return %arg0, %c0_i32 : i32, i32
  }
  func.func @transform_1(%arg0: i32, %arg1: memref<2xf32, #tpu.memory_space<smem>>) -> (i32, i32) {
    %c0_i32 = arith.constant 0 : i32
    %c0_i32_0 = arith.constant 0 : i32
    return %arg0, %c0_i32 : i32, i32
  }
  func.func @transform_2(%arg0: i32, %arg1: memref<2xf32, #tpu.memory_space<smem>>) -> (i32, i32, i32) {
    %c0_i32 = arith.constant 0 : i32
    %c0_i32_0 = arith.constant 0 : i32
    %c0_i32_1 = arith.constant 0 : i32
    return %arg0, %c0_i32, %c0_i32_0 : i32, i32, i32
  }
}

</mosaic_0001>

<bundles_post_ra>
// kernel: tpu_custom_call.1
= control target key start
LH: loop header
LB: loop body
LE: loop exit
PB: predicated region body
PF: predicated region fallthrough
CT: control target
= control target key end

     0   :  { %s211_s0 = inlined_call_operand.hbm [shape: f32[2], index: 0, kind: input, shape index: {}]   ;;  %s212_s1 = inlined_call_operand.hbm [shape: f32[4,128], index: 1, kind: input, shape index: {}]   ;;  %s213_s2 = inlined_call_operand.vmem [shape: s8[4,128], index: 2, kind: input, shape index: {}]   ;;  %s214_s3 = inlined_call_operand.hbm [shape: f32[1,1,128], index: 3, kind: output, shape index: {}]  }
   0x1   :  { %s88_s14 = scalar_lea.hbm %s211_s0, 16 }
   0x2   :  { %p89_p0 = scmp.ne.s32.totalorder %s211_s0, %s88_s14  ;;  %p92_p1 = scmp.lt.u32.totalorder %s88_s14, %s211_s0 }
   0x4   :  { %p94_p2 = pnand %p92_p1, %p89_p0 }
   0x6   :  { %97 = shalt.err (!%p94_p2)  }
   0x7   :  { %s148_s19 = smov [#allocation3]  }
   0x8   :  { %9 = dma.hbm_to_smem %s211_s0, 16, %s148_s19, [#allocation2] }
   0x9   :  { %142 = dma.done.wait [#allocation2], 16 }
   0xa   :  { %143 = vsyncadd [#allocation2], 4294967280 }
   0xb   :  { %11 = sfence }
   0xc   :  { %12 = vsyncpa [#allocation5], 0 }
   0xd   :  { %13 = vsyncpa [#allocation6], 0  ;;  %s149_s22 = smov [#allocation4]   ;;  %s98_s26 = scalar_lea.hbm %s212_s1, 64 }
   0xe   :  { %s20_s23 = sshll.u32 %s149_s22, 4  ;;  %p99_p3 = scmp.ne.s32.totalorder %s212_s1, %s98_s26  ;;  %s21_s23 = int_to_ptr.vmem [resolvable:$true] %s20_s23 }
   0xf   :  { %p102_p4 = scmp.lt.u32.totalorder %s98_s26, %s212_s1 }
  0x11   :  { %p104_p5 = pnand %p102_p4, %p99_p3 }
  0x13   :  { %107 = shalt.err (!%p104_p5)
}
  0x14   :  { %s108_s0 = scalar_lea.vmem %s21_s23, 64  ;;  %p113_p7 = scmp.lt.s32.totalorder %s21_s23, %s21_s23 }
  0x15   :  { %p109_p6 = scmp.ne.s32.totalorder %s21_s23, %s108_s0  ;;  %p114_p8 = scmp.lt.s32.totalorder %s108_s0, %s108_s0 }
  0x17   :  { %p115_p9 = por %p114_p8, %p113_p7 }
  0x19   :  { %p116_p10 = pnand %p115_p9, %p109_p6 }
  0x1b   :  { %119 = shalt.err (!%p116_p10)
}
  0x1c   :  { %23 = dma.hbm_to_vmem [thread:$0]  %s212_s1, 64, %s21_s23, [#allocation5]  }
  0x1d   :  { %144 = dma.done.wait [#allocation5], 64  }
  0x1e   :  { %145 = vsyncadd [#allocation5], 4294967232  ;;  %v31_v0 = vld [vmem:[#allocation4] sm:$0xf]  ;;  %v150_v5 = vmov 0   ;;  %vm53_vm2 = vcmask 1043456  }
  0x1f   :  { %v77_v1 = vmul.f32 -1.442695, %v31_v0  ;;  %v32_v3 = vld [vmem:[%s213_s2] sm:$0x1]  ;;  %s151_s1 = smov [#allocation7]  }
  0x20   :  { %vm33_vm0 = vnez %v32_v3  ;;  %s68_s2 = sshll.u32 %s151_s1, 4  ;;  %s69_s2 = int_to_ptr.vmem [resolvable:$true] %s68_s2 }
  0x21   :  { %82 = vpow2.f32 %v77_v1  ;;  %v41_v6 = vsel %vm33_vm0, 16843009, %v150_v5  ;;  %s120_s8 = scalar_lea.vmem %s69_s2, 16  ;;  %s124_s9 = scalar_lea.vmem %s69_s2, 32 }
  0x22   :  { %v42_v7 = vunpack.c.0.s8 %v41_v6  ;;  %p121_p11 = scmp.ne.s32.totalorder %s69_s2, %s120_s8  ;;  %p125_p12 = scmp.lt.s32.totalorder %s69_s2, %s69_s2 }
  0x23   :  { %p126_p13 = scmp.lt.s32.totalorder %s124_s9, %s120_s8 }
  0x24   :  { %vm43_vm1 = vcmp.ne.s32.totalorder %v42_v7, 0 }
  0x25   :  { %p127_p0 = por %p126_p13, %p125_p12 }
  0x27   :  { %p128_p1 = pnand %p127_p0, %p121_p11 }
  0x2b   :  { %v83_v2 = vpop.eup %82 }
  0x2c   :  { %v37_v4 = vadd.f32 1.0, %v83_v2 }
  0x2e   :  { %84 = vrcp.f32 %v37_v4 }
  0x38   :  { %v85_v8 = vpop.eup %84 }
  0x39   :  { %v40_v9 = vsub.f32 1.0, %v85_v8 }
  0x3b   :  { %v44_v10 = vsel %vm43_vm1, %v85_v8, %v40_v9 }
  0x3c   :  { %v45_v11 = vmax.f32 %v44_v10, 1e-08 }
  0x3e   :  { %v46_v12 = vmin.f32 %v45_v11, 1.0 }
  0x40   :  { %86 = vlog2.f32 %v46_v12  ;;  %v47_v13 = vsub.f32 1.0, %v46_v12 }
  0x42   :  { %v48_v15 = vmul.f32 %v47_v13, %v47_v13 }
  0x4a   :  { %v87_v14 = vpop.eup %86 }
  0x4b   :  { %v50_v16 = vmul.f32 0.6931472, %v87_v14 }
  0x4d   :  { %v51_v17 = vsub.f32 0.0, %v50_v16 }
  0x4f   :  { %v52_v18 = vmul.f32 %v51_v17, %v48_v15 }
  0x51   :  { %v54_v19 = vsel %vm53_vm2, %v52_v18, 0.0 }
  0x52   :  { %v55_v20 = vrot.slane %v54_v19, 4 }
  0x54   :  { %v56_v21 = vadd.f32 %v55_v20, %v54_v19 }
  0x56   :  { %v57_v22 = vrot.slane %v56_v21, 2 }
  0x58   :  { %v58_v23 = vadd.f32 %v57_v22, %v56_v21 }
  0x5a   :  { %v59_v24 = vrot.slane %v58_v23, 1 }
  0x5c   :  { %v60_v25 = vadd.f32 %v59_v24, %v58_v23 }
  0x5e   :  { %61 = vst [vmem:[#allocation7] sm:$0x1] %v60_v25 }
  0x5f   :  { %131 = shalt.err (!%p128_p1)
}
  0x60   :  { %s132_s12 = scalar_lea.hbm %s214_s3, 16 }
  0x61   :  { %p133_p2 = scmp.ne.s32.totalorder %s214_s3, %s132_s12  ;;  %p136_p3 = scmp.lt.u32.totalorder %s132_s12, %s214_s3 }
  0x63   :  { %p138_p4 = pnand %p136_p3, %p133_p2 }
  0x65   :  { %141 = shalt.err (!%p138_p4)
}
  0x66   :  { %71 = dma.vmem_to_hbm [thread:$0]  %s69_s2, 16, %s214_s3, [#allocation6]  }
  0x67   :  { %146 = dma.done.wait [#allocation6], 16  }
  0x68   :  { %147 = vsyncadd [#allocation6], 4294967280 }
  0x69   :  { %75 = vsyncpa [#allocation5], 1 }
  0x6a   :  { %76 = vsyncpa [#allocation6], 1 }

</bundles_post_ra>
